<compile_context>
chip_gen: v5e
topology: v5e:2x2
jax: 0.10.0
libtpu: 0.0.40
codegen_flags: <defaults>
</compile_context>

<pallas_src>
import jax
import jax.numpy as jnp
from jax.experimental import pallas as pl
from jax.experimental.pallas import tpu as pltpu

EPS = 1e-5
NEG_BIAS = -100000.0


def _vmem_limit_bytes():
    # Leave headroom below physical VMEM (v7x: 64 MiB, v5e/v6e: 128 MiB).
    try:
        cap = int(pltpu.get_tpu_info().vmem_capacity_bytes)
    except Exception:
        cap = 64 * 1024 * 1024
    return int(min(cap * 3 // 4, 96 * 1024 * 1024))


def _ln(x, g, b):
    u = jnp.mean(x, axis=-1, keepdims=True)
    d = x - u
    var = jnp.mean(d * d, axis=-1, keepdims=True)
    return d * jax.lax.rsqrt(var + EPS) * g + b        # rsqrt -> EUP slot


# --------------------------------------------------------------------------
# Fused pre-norm transformer encoder layer kernel (one grid step = one seq)
# --------------------------------------------------------------------------
def _make_fused_layer_kernel(n_head, head_dim):
    scale = 1.0 / float(head_dim) ** 0.5

    def kernel(x_ref, bias_ref, ln1g_ref, ln1b_ref, w_in_ref, b_in_ref,
               w_o_ref, b_o_ref, ln2g_ref, ln2b_ref, w1_ref, b1_ref,
               w2_ref, b2_ref, o_ref):
        x = x_ref[...].astype(jnp.float32)               # (L, D) residual stream
        L, D = x.shape

        # ---- self-attention block: x = x + out_proj(MHA(LN1(x))) ----
        xn = _ln(x, ln1g_ref[...], ln1b_ref[...])
        qkv = jnp.dot(xn.astype(jnp.bfloat16), w_in_ref[...],
                      preferred_element_type=jnp.float32) + b_in_ref[...]   # (L, 3D)
        bias = bias_ref[...]                             # (1, L) additive key bias

        attn_proj = jnp.zeros((L, D), jnp.float32)
        for h in range(n_head):                          # unrolled at trace time
            lo = h * head_dim
            hi = lo + head_dim
            q = qkv[:, lo:hi] * scale                    # fold 1/sqrt(hd) into q
            k = qkv[:, D + lo:D + hi]
            v = qkv[:, 2 * D + lo:2 * D + hi]
            s = jax.lax.dot_general(q.astype(jnp.bfloat16), k.astype(jnp.bfloat16),
                                    (((1,), (1,)), ((), ())),
                                    preferred_element_type=jnp.float32)     # (L, L)
            s = s + bias                                 # broadcast over query rows
            m = jnp.max(s, axis=-1, keepdims=True)
            p = jnp.exp(s - m)
            l = jnp.sum(p, axis=-1, keepdims=True)
            o = jnp.dot(p.astype(jnp.bfloat16), v.astype(jnp.bfloat16),
                        preferred_element_type=jnp.float32)
            o = o * pl.reciprocal(l, approx=True)
            # out_proj folded per head: concat_h(o_h) @ Wo^T == sum_h o_h @ Wo^T[h-rows]
            attn_proj += jnp.dot(o.astype(jnp.bfloat16), w_o_ref[lo:hi, :],
                                 preferred_element_type=jnp.float32)
        x = x + attn_proj + b_o_ref[...]

        # ---- feed-forward block: x = x + W2 relu(W1 LN2(x) + b1) + b2 ----
        xn2 = _ln(x, ln2g_ref[...], ln2b_ref[...])
        hmid = jnp.dot(xn2.astype(jnp.bfloat16), w1_ref[...],
                       preferred_element_type=jnp.float32) + b1_ref[...]
        hmid = jnp.maximum(hmid, 0.0)
        y = x + jnp.dot(hmid.astype(jnp.bfloat16), w2_ref[...],
                        preferred_element_type=jnp.float32) + b2_ref[...]
        o_ref[...] = y.astype(o_ref.dtype)

    return kernel


def _fused_encoder_layer(x3, bias_row, kp, *, n_head):
    """x3: (B, L, D) f32; bias_row: (B, 1, L) f32 additive key-padding bias."""
    B, L, D = x3.shape
    F = kp["w1_t"].shape[1]
    hd = D // n_head
    const = lambda b: (0, 0)

    flops = B * (2 * L * D * 3 * D            # qkv projection
                 + n_head * 4 * L * L * hd    # qk^T + pv
                 + 2 * L * D * D              # out projection
                 + 4 * L * D * F)             # FFN
    transcendentals = B * (n_head * L * L + 2 * L)
    bytes_accessed = int(x3.size * 4 + bias_row.size * 4 + B * L * D * 4
                         + 2 * (D * 3 * D + D * D + 2 * D * F)     # bf16 weights
                         + 4 * (3 * D + 7 * D + F))                # f32 vectors

    # TODO(synk): for very long sequences (L*L f32 scores exceeding VMEM) a
    # flash-style KV-tiled variant would be needed; not required at Wayformer
    # encoder-block shapes.
    return pl.pallas_call(
        _make_fused_layer_kernel(n_head, hd),
        out_shape=jax.ShapeDtypeStruct((B, L, D), jnp.float32),
        grid_spec=pltpu.PrefetchScalarGridSpec(
            num_scalar_prefetch=0,
            grid=(B,),
            in_specs=[
                pl.BlockSpec((None, L, D), lambda b: (b, 0, 0)),   # x
                pl.BlockSpec((None, 1, L), lambda b: (b, 0, 0)),   # key bias row
                pl.BlockSpec((1, D), const),                       # ln1 gamma
                pl.BlockSpec((1, D), const),                       # ln1 beta
                pl.BlockSpec((D, 3 * D), const),                   # W_in^T (bf16)
                pl.BlockSpec((1, 3 * D), const),                   # b_in
                pl.BlockSpec((D, D), const),                       # W_o^T  (bf16)
                pl.BlockSpec((1, D), const),                       # b_o
                pl.BlockSpec((1, D), const),                       # ln2 gamma
                pl.BlockSpec((1, D), const),                       # ln2 beta
                pl.BlockSpec((D, F), const),                       # W_1^T  (bf16)
                pl.BlockSpec((1, F), const),                       # b_1
                pl.BlockSpec((F, D), const),                       # W_2^T  (bf16)
                pl.BlockSpec((1, D), const),                       # b_2
            ],
            out_specs=pl.BlockSpec((None, L, D), lambda b: (b, 0, 0)),
        ),
        compiler_params=pltpu.CompilerParams(
            dimension_semantics=("parallel",),
            vmem_limit_bytes=_vmem_limit_bytes(),
        ),
        cost_estimate=pl.CostEstimate(
            flops=flops, transcendentals=transcendentals,
            bytes_accessed=bytes_accessed),
    )(x3, bias_row, kp["ln1_g"], kp["ln1_b"], kp["w_in_t"], kp["b_in"],
      kp["w_o_t"], kp["b_o"], kp["ln2_g"], kp["ln2_b"], kp["w1_t"], kp["b1"],
      kp["w2_t"], kp["b2"])


# --------------------------------------------------------------------------
# EncoderBlock forward (rearranges + mask handling + fused encoder layer)
# --------------------------------------------------------------------------
def encoder_block_forward(x, mask, kp, *, option="temporal", n_head=4):
    A, T, S, D = x.shape
    assert D % n_head == 0
    if option == "temporal":            # 'A T S D -> (A S) T D'
        x3 = jnp.transpose(x, (0, 2, 1, 3)).reshape(A * S, T, D)
        m2 = None if mask is None else jnp.transpose(mask, (0, 2, 1)).reshape(A * S, T)
    elif option == "spacial":           # 'A T S D -> (A T) S D'
        x3 = x.reshape(A * T, S, D)
        m2 = None if mask is None else mask.reshape(A * T, S)
    elif option == "multi_axis":        # 'A T S D -> A (T S) D'
        x3 = x.reshape(A, T * S, D)
        m2 = None if mask is None else mask.reshape(A, T * S)
    else:
        raise NotImplementedError(option)

    B, L, _ = x3.shape
    if m2 is not None:
        all_true = jnp.all(m2, axis=1, keepdims=True)
        m2 = jnp.where(all_true, False, m2)              # reset fully-masked rows
        bias_row = jnp.where(m2, NEG_BIAS, 0.0).astype(jnp.float32)[:, None, :]
    else:
        bias_row = jnp.zeros((B, 1, L), jnp.float32)     # tiny, O(B*L)

    y3 = _fused_encoder_layer(x3.astype(jnp.float32), bias_row, kp, n_head=n_head)

    if option == "temporal":            # '(A S) T D -> A T S D'
        return jnp.transpose(y3.reshape(A, S, T, D), (0, 2, 1, 3))
    if option == "spacial":             # '(A T) S D -> A T S D'
        return y3.reshape(A, T, S, D)
    return y3                           # multi_axis keeps (A, T*S, D)


# --------------------------------------------------------------------------
# Parameters (torch-like), one-time kernel prep, pure-JAX f32 reference
# --------------------------------------------------------------------------
def init_params(key, D, F):
    ks = jax.random.split(key, 4)

    def lin(k, out_f, in_f):
        bound = 1.0 / (in_f ** 0.5)
        kw, kb = jax.random.split(k)
        w = jax.random.uniform(kw, (out_f, in_f), jnp.float32, -bound, bound)
        b = jax.random.uniform(kb, (out_f,), jnp.float32, -bound, bound)
        return w, b

    w_in, b_in = lin(ks[0], 3 * D, D)
    w_o, b_o = lin(ks[1], D, D)
    w1, b1 = lin(ks[2], F, D)
    w2, b2 = lin(ks[3], D, F)
    return dict(w_in=w_in, b_in=b_in, w_o=w_o, b_o=b_o, w1=w1, b1=b1,
                w2=w2, b2=b2,
                ln1_g=jnp.ones((D,), jnp.float32), ln1_b=jnp.zeros((D,), jnp.float32),
                ln2_g=jnp.ones((D,), jnp.float32), ln2_b=jnp.zeros((D,), jnp.float32))


def prepare_params(p):
    """One-time prep: pre-transpose + cast weights to bf16, vectors to (1,.) f32."""
    r = lambda v: v.reshape(1, -1).astype(jnp.float32)
    return dict(
        ln1_g=r(p["ln1_g"]), ln1_b=r(p["ln1_b"]),
        ln2_g=r(p["ln2_g"]), ln2_b=r(p["ln2_b"]),
        w_in_t=p["w_in"].T.astype(jnp.bfloat16), b_in=r(p["b_in"]),
        w_o_t=p["w_o"].T.astype(jnp.bfloat16), b_o=r(p["b_o"]),
        w1_t=p["w1"].T.astype(jnp.bfloat16), b1=r(p["b1"]),
        w2_t=p["w2"].T.astype(jnp.bfloat16), b2=r(p["b2"]),
    )


def _ln_ref(x, g, b):
    u = x.mean(-1, keepdims=True)
    v = ((x - u) ** 2).mean(-1, keepdims=True)
    return (x - u) / jnp.sqrt(v + EPS) * g + b


def ref_encoder_block(x, mask, p, *, option, n_head):
    A, T, S, D = x.shape
    if option == "temporal":
        x3 = jnp.transpose(x, (0, 2, 1, 3)).reshape(A * S, T, D)
        m2 = jnp.transpose(mask, (0, 2, 1)).reshape(A * S, T)
    elif option == "spacial":
        x3 = x.reshape(A * T, S, D)
        m2 = mask.reshape(A * T, S)
    else:
        x3 = x.reshape(A, T * S, D)
        m2 = mask.reshape(A, T * S)
    B, L, _ = x3.shape
    all_true = jnp.all(m2, axis=1, keepdims=True)
    m2 = jnp.where(all_true, False, m2)
    bias = jnp.where(m2[:, None, :], NEG_BIAS, 0.0).astype(jnp.float32)
    hd = D // n_head

    xn = _ln_ref(x3, p["ln1_g"], p["ln1_b"])
    qkv = xn @ p["w_in"].T + p["b_in"]
    q, k, v = jnp.split(qkv, 3, axis=-1)

    def heads(t):
        return jnp.transpose(t.reshape(B, L, n_head, hd), (0, 2, 1, 3))

    qh, kh, vh = heads(q), heads(k), heads(v)
    s = jnp.einsum("bhqd,bhkd->bhqk", qh, kh) / (float(hd) ** 0.5) + bias[:, None, :, :]
    a = jax.nn.softmax(s, axis=-1)
    o = jnp.transpose(jnp.einsum("bhqk,bhkd->bhqd", a, vh), (0, 2, 1, 3)).reshape(B, L, D)
    x3 = x3 + o @ p["w_o"].T + p["b_o"]
    xn = _ln_ref(x3, p["ln2_g"], p["ln2_b"])
    h = jnp.maximum(xn @ p["w1"].T + p["b1"], 0.0)
    y3 = x3 + h @ p["w2"].T + p["b2"]

    if option == "temporal":
        return jnp.transpose(y3.reshape(A, S, T, D), (0, 2, 1, 3))
    if option == "spacial":
        return y3.reshape(A, T, S, D)
    return y3


if __name__ == "__main__":
    # Small shapes consistent with the module: A=2, T=8, S=4, D=32
    A, T, S, D = 2, 8, 4, 32
    n_head, dim_ff = 4, 64

    key = jax.random.PRNGKey(0)
    kx, kp = jax.random.split(key)
    x = jax.random.normal(kx, (A, T, S, D), dtype=jnp.float32)

    # key-padding mask: one fully-padded row (exercises the all_true reset)
    # and one partially padded row.
    mask = jnp.zeros((A, T, S), dtype=bool)
    mask = mask.at[0, :, 0].set(True)
    mask = mask.at[1, 5:, 2].set(True)

    raw_params = init_params(kp, D, dim_ff)
    params = prepare_params(raw_params)          # one-time transpose / bf16 cast

    for option in ("temporal", "multi_axis"):
        y = encoder_block_forward(x, mask, params, option=option, n_head=n_head)
        jax.block_until_ready(y)
        ref = ref_encoder_block(x, mask, raw_params, option=option, n_head=n_head)
        assert y.shape == ref.shape, (option, y.shape, ref.shape)
        # bf16 matmuls + approx reciprocal -> loosened tolerance vs f32 reference
        err = float(jnp.max(jnp.abs(y - ref)))
        assert jnp.allclose(y, ref, atol=5e-2, rtol=5e-2), (option, err)

    # TODO(synk): dropout layers are treated as identity (eval mode); no RNG path.
    print("KERNEL_OK")
</pallas_src>

<mosaic_0001>
module attributes {stable_mosaic.version = 11 : i64} {
  func.func @kernel(%arg0: i32, %arg1: memref<1x8x32xf32, #tpu.memory_space<vmem>>, %arg2: memref<1x1x8xf32, #tpu.memory_space<vmem>>, %arg3: memref<1x32xf32, #tpu.memory_space<vmem>>, %arg4: memref<1x32xf32, #tpu.memory_space<vmem>>, %arg5: memref<32x96xbf16, #tpu.memory_space<vmem>>, %arg6: memref<1x96xf32, #tpu.memory_space<vmem>>, %arg7: memref<32x32xbf16, #tpu.memory_space<vmem>>, %arg8: memref<1x32xf32, #tpu.memory_space<vmem>>, %arg9: memref<1x32xf32, #tpu.memory_space<vmem>>, %arg10: memref<1x32xf32, #tpu.memory_space<vmem>>, %arg11: memref<32x64xbf16, #tpu.memory_space<vmem>>, %arg12: memref<1x64xf32, #tpu.memory_space<vmem>>, %arg13: memref<64x32xbf16, #tpu.memory_space<vmem>>, %arg14: memref<1x32xf32, #tpu.memory_space<vmem>>, %arg15: memref<1x8x32xf32, #tpu.memory_space<vmem>>) attributes {dimension_semantics = [#tpu.dimension_semantics<parallel>], iteration_bounds = array<i64: 8>, scalar_prefetch = 0 : i64, scratch_operands = 0 : i64, tpu.core_type = #tpu.core_type<tc>, window_params = [{transform_indices = @transform_0, window_bounds = array<i64: 1, 8, 32>}, {transform_indices = @transform_1, window_bounds = array<i64: 1, 1, 8>}, {pipeline_mode = #tpu.pipeline_mode<synchronous>, transform_indices = @transform_2, window_bounds = array<i64: 1, 32>}, {pipeline_mode = #tpu.pipeline_mode<synchronous>, transform_indices = @transform_3, window_bounds = array<i64: 1, 32>}, {pipeline_mode = #tpu.pipeline_mode<synchronous>, transform_indices = @transform_4, window_bounds = array<i64: 32, 96>}, {pipeline_mode = #tpu.pipeline_mode<synchronous>, transform_indices = @transform_5, window_bounds = array<i64: 1, 96>}, {pipeline_mode = #tpu.pipeline_mode<synchronous>, transform_indices = @transform_6, window_bounds = array<i64: 32, 32>}, {pipeline_mode = #tpu.pipeline_mode<synchronous>, transform_indices = @transform_7, window_bounds = array<i64: 1, 32>}, {pipeline_mode = #tpu.pipeline_mode<synchronous>, transform_indices = @transform_8, window_bounds = array<i64: 1, 32>}, {pipeline_mode = #tpu.pipeline_mode<synchronous>, transform_indices = @transform_9, window_bounds = array<i64: 1, 32>}, {pipeline_mode = #tpu.pipeline_mode<synchronous>, transform_indices = @transform_10, window_bounds = array<i64: 32, 64>}, {pipeline_mode = #tpu.pipeline_mode<synchronous>, transform_indices = @transform_11, window_bounds = array<i64: 1, 64>}, {pipeline_mode = #tpu.pipeline_mode<synchronous>, transform_indices = @transform_12, window_bounds = array<i64: 64, 32>}, {pipeline_mode = #tpu.pipeline_mode<synchronous>, transform_indices = @transform_13, window_bounds = array<i64: 1, 32>}, {transform_indices = @transform_14, window_bounds = array<i64: 1, 8, 32>}]} {
    %c0 = arith.constant 0 : index
    %c0_0 = arith.constant 0 : index
    %c0_1 = arith.constant 0 : index
    %0 = vector.load %arg1[%c0, %c0_0, %c0_1] : memref<1x8x32xf32, #tpu.memory_space<vmem>>, vector<1x8x32xf32>
    %1 = vector.shape_cast %0 : vector<1x8x32xf32> to vector<8x32xf32>
    %c0_2 = arith.constant 0 : index
    %c0_3 = arith.constant 0 : index
    %2 = vector.load %arg3[%c0_2, %c0_3] : memref<1x32xf32, #tpu.memory_space<vmem>>, vector<1x32xf32>
    %c0_4 = arith.constant 0 : index
    %c0_5 = arith.constant 0 : index
    %3 = vector.load %arg4[%c0_4, %c0_5] : memref<1x32xf32, #tpu.memory_space<vmem>>, vector<1x32xf32>
    %cst = arith.constant dense<0.000000e+00> : vector<8xf32>
    %4 = vector.multi_reduction <add>, %1, %cst [1] : vector<8x32xf32> to vector<8xf32>
    %5 = vector.shape_cast %4 : vector<8xf32> to vector<8x1xf32>
    %cst_6 = arith.constant 3.200000e+01 : f32
    %6 = vector.broadcast %cst_6 : f32 to vector<8x1xf32>
    %7 = arith.divf %5, %6 : vector<8x1xf32>
    %8 = vector.broadcast %7 : vector<8x1xf32> to vector<8x32xf32>
    %9 = arith.subf %1, %8 : vector<8x32xf32>
    %10 = arith.mulf %9, %9 : vector<8x32xf32>
    %cst_7 = arith.constant dense<0.000000e+00> : vector<8xf32>
    %11 = vector.multi_reduction <add>, %10, %cst_7 [1] : vector<8x32xf32> to vector<8xf32>
    %12 = vector.shape_cast %11 : vector<8xf32> to vector<8x1xf32>
    %cst_8 = arith.constant 3.200000e+01 : f32
    %13 = vector.broadcast %cst_8 : f32 to vector<8x1xf32>
    %14 = arith.divf %12, %13 : vector<8x1xf32>
    %cst_9 = arith.constant 9.99999974E-6 : f32
    %15 = vector.broadcast %cst_9 : f32 to vector<8x1xf32>
    %16 = arith.addf %14, %15 : vector<8x1xf32>
    %17 = math.rsqrt %16 : vector<8x1xf32>
    %18 = vector.broadcast %17 : vector<8x1xf32> to vector<8x32xf32>
    %19 = arith.mulf %9, %18 : vector<8x32xf32>
    %20 = vector.broadcast %2 : vector<1x32xf32> to vector<8x32xf32>
    %21 = arith.mulf %19, %20 : vector<8x32xf32>
    %22 = vector.broadcast %3 : vector<1x32xf32> to vector<8x32xf32>
    %23 = arith.addf %21, %22 : vector<8x32xf32>
    %24 = arith.truncf %23 : vector<8x32xf32> to vector<8x32xbf16>
    %c0_10 = arith.constant 0 : index
    %c0_11 = arith.constant 0 : index
    %25 = vector.load %arg5[%c0_10, %c0_11] : memref<32x96xbf16, #tpu.memory_space<vmem>>, vector<32x96xbf16>
    %cst_12 = arith.constant dense<0.000000e+00> : vector<8x96xf32>
    %26 = tpu.matmul %24, %25, %cst_12 {dimension_numbers = #tpu.dot_dimension_numbers<[1], [0], [0], [1], [0, 0, 1, 1], [], []>} : vector<8x32xbf16>, vector<32x96xbf16>, vector<8x96xf32> -> vector<8x96xf32>
    %c0_13 = arith.constant 0 : index
    %c0_14 = arith.constant 0 : index
    %27 = vector.load %arg6[%c0_13, %c0_14] : memref<1x96xf32, #tpu.memory_space<vmem>>, vector<1x96xf32>
    %28 = vector.broadcast %27 : vector<1x96xf32> to vector<8x96xf32>
    %29 = arith.addf %26, %28 : vector<8x96xf32>
    %c0_15 = arith.constant 0 : index
    %c0_16 = arith.constant 0 : index
    %c0_17 = arith.constant 0 : index
    %30 = vector.load %arg2[%c0_15, %c0_16, %c0_17] : memref<1x1x8xf32, #tpu.memory_space<vmem>>, vector<1x1x8xf32>
    %31 = vector.shape_cast %30 : vector<1x1x8xf32> to vector<1x8xf32>
    %cst_18 = arith.constant 0.000000e+00 : f32
    %32 = vector.broadcast %cst_18 : f32 to vector<8x32xf32>
    %33 = vector.extract_strided_slice %29 {offsets = [0, 0], sizes = [8, 8], strides = [1, 1]} : vector<8x96xf32> to vector<8x8xf32>
    %cst_19 = arith.constant 0.353553385 : f32
    %34 = vector.broadcast %cst_19 : f32 to vector<8x8xf32>
    %35 = arith.mulf %33, %34 : vector<8x8xf32>
    %36 = vector.extract_strided_slice %29 {offsets = [0, 32], sizes = [8, 8], strides = [1, 1]} : vector<8x96xf32> to vector<8x8xf32>
    %37 = vector.extract_strided_slice %29 {offsets = [0, 64], sizes = [8, 8], strides = [1, 1]} : vector<8x96xf32> to vector<8x8xf32>
    %38 = arith.truncf %35 : vector<8x8xf32> to vector<8x8xbf16>
    %39 = arith.truncf %36 : vector<8x8xf32> to vector<8x8xbf16>
    %cst_20 = arith.constant dense<0.000000e+00> : vector<8x8xf32>
    %40 = tpu.matmul %38, %39, %cst_20 {dimension_numbers = #tpu.dot_dimension_numbers<[1], [1], [0], [0], [0, 0, 1, 0], [], []>} : vector<8x8xbf16>, vector<8x8xbf16>, vector<8x8xf32> -> vector<8x8xf32>
    %41 = vector.broadcast %31 : vector<1x8xf32> to vector<8x8xf32>
    %42 = arith.addf %40, %41 : vector<8x8xf32>
    %cst_21 = arith.constant dense<0xFF800000> : vector<8xf32>
    %43 = vector.multi_reduction <maximumf>, %42, %cst_21 [1] : vector<8x8xf32> to vector<8xf32>
    %44 = vector.shape_cast %43 : vector<8xf32> to vector<8x1xf32>
    %45 = vector.broadcast %44 : vector<8x1xf32> to vector<8x8xf32>
    %46 = arith.subf %42, %45 : vector<8x8xf32>
    %47 = math.exp %46 : vector<8x8xf32>
    %cst_22 = arith.constant dense<0.000000e+00> : vector<8xf32>
    %48 = vector.multi_reduction <add>, %47, %cst_22 [1] : vector<8x8xf32> to vector<8xf32>
    %49 = vector.shape_cast %48 : vector<8xf32> to vector<8x1xf32>
    %50 = arith.truncf %47 : vector<8x8xf32> to vector<8x8xbf16>
    %51 = arith.truncf %37 : vector<8x8xf32> to vector<8x8xbf16>
    %cst_23 = arith.constant dense<0.000000e+00> : vector<8x8xf32>
    %52 = tpu.matmul %50, %51, %cst_23 {dimension_numbers = #tpu.dot_dimension_numbers<[1], [0], [0], [1], [0, 0, 1, 1], [], []>} : vector<8x8xbf16>, vector<8x8xbf16>, vector<8x8xf32> -> vector<8x8xf32>
    %53 = tpu.reciprocal %49 {approx = true} : vector<8x1xf32> -> vector<8x1xf32>
    %54 = vector.broadcast %53 : vector<8x1xf32> to vector<8x8xf32>
    %55 = arith.mulf %52, %54 : vector<8x8xf32>
    %56 = arith.truncf %55 : vector<8x8xf32> to vector<8x8xbf16>
    %c0_24 = arith.constant 0 : index
    %c0_25 = arith.constant 0 : index
    %57 = vector.load %arg7[%c0_24, %c0_25] : memref<32x32xbf16, #tpu.memory_space<vmem>>, vector<8x32xbf16>
    %cst_26 = arith.constant dense<0.000000e+00> : vector<8x32xf32>
    %58 = tpu.matmul %56, %57, %cst_26 {dimension_numbers = #tpu.dot_dimension_numbers<[1], [0], [0], [1], [0, 0, 1, 1], [], []>} : vector<8x8xbf16>, vector<8x32xbf16>, vector<8x32xf32> -> vector<8x32xf32>
    %59 = arith.addf %32, %58 : vector<8x32xf32>
    %60 = vector.extract_strided_slice %29 {offsets = [0, 8], sizes = [8, 8], strides = [1, 1]} : vector<8x96xf32> to vector<8x8xf32>
    %cst_27 = arith.constant 0.353553385 : f32
    %61 = vector.broadcast %cst_27 : f32 to vector<8x8xf32>
    %62 = arith.mulf %60, %61 : vector<8x8xf32>
    %63 = vector.extract_strided_slice %29 {offsets = [0, 40], sizes = [8, 8], strides = [1, 1]} : vector<8x96xf32> to vector<8x8xf32>
    %64 = vector.extract_strided_slice %29 {offsets = [0, 72], sizes = [8, 8], strides = [1, 1]} : vector<8x96xf32> to vector<8x8xf32>
    %65 = arith.truncf %62 : vector<8x8xf32> to vector<8x8xbf16>
    %66 = arith.truncf %63 : vector<8x8xf32> to vector<8x8xbf16>
    %cst_28 = arith.constant dense<0.000000e+00> : vector<8x8xf32>
    %67 = tpu.matmul %65, %66, %cst_28 {dimension_numbers = #tpu.dot_dimension_numbers<[1], [1], [0], [0], [0, 0, 1, 0], [], []>} : vector<8x8xbf16>, vector<8x8xbf16>, vector<8x8xf32> -> vector<8x8xf32>
    %68 = vector.broadcast %31 : vector<1x8xf32> to vector<8x8xf32>
    %69 = arith.addf %67, %68 : vector<8x8xf32>
    %cst_29 = arith.constant dense<0xFF800000> : vector<8xf32>
    %70 = vector.multi_reduction <maximumf>, %69, %cst_29 [1] : vector<8x8xf32> to vector<8xf32>
    %71 = vector.shape_cast %70 : vector<8xf32> to vector<8x1xf32>
    %72 = vector.broadcast %71 : vector<8x1xf32> to vector<8x8xf32>
    %73 = arith.subf %69, %72 : vector<8x8xf32>
    %74 = math.exp %73 : vector<8x8xf32>
    %cst_30 = arith.constant dense<0.000000e+00> : vector<8xf32>
    %75 = vector.multi_reduction <add>, %74, %cst_30 [1] : vector<8x8xf32> to vector<8xf32>
    %76 = vector.shape_cast %75 : vector<8xf32> to vector<8x1xf32>
    %77 = arith.truncf %74 : vector<8x8xf32> to vector<8x8xbf16>
    %78 = arith.truncf %64 : vector<8x8xf32> to vector<8x8xbf16>
    %cst_31 = arith.constant dense<0.000000e+00> : vector<8x8xf32>
    %79 = tpu.matmul %77, %78, %cst_31 {dimension_numbers = #tpu.dot_dimension_numbers<[1], [0], [0], [1], [0, 0, 1, 1], [], []>} : vector<8x8xbf16>, vector<8x8xbf16>, vector<8x8xf32> -> vector<8x8xf32>
    %80 = tpu.reciprocal %76 {approx = true} : vector<8x1xf32> -> vector<8x1xf32>
    %81 = vector.broadcast %80 : vector<8x1xf32> to vector<8x8xf32>
    %82 = arith.mulf %79, %81 : vector<8x8xf32>
    %83 = arith.truncf %82 : vector<8x8xf32> to vector<8x8xbf16>
    %c8 = arith.constant 8 : index
    %c0_32 = arith.constant 0 : index
    %84 = vector.load %arg7[%c8, %c0_32] : memref<32x32xbf16, #tpu.memory_space<vmem>>, vector<8x32xbf16>
    %cst_33 = arith.constant dense<0.000000e+00> : vector<8x32xf32>
    %85 = tpu.matmul %83, %84, %cst_33 {dimension_numbers = #tpu.dot_dimension_numbers<[1], [0], [0], [1], [0, 0, 1, 1], [], []>} : vector<8x8xbf16>, vector<8x32xbf16>, vector<8x32xf32> -> vector<8x32xf32>
    %86 = arith.addf %59, %85 : vector<8x32xf32>
    %87 = vector.extract_strided_slice %29 {offsets = [0, 16], sizes = [8, 8], strides = [1, 1]} : vector<8x96xf32> to vector<8x8xf32>
    %cst_34 = arith.constant 0.353553385 : f32
    %88 = vector.broadcast %cst_34 : f32 to vector<8x8xf32>
    %89 = arith.mulf %87, %88 : vector<8x8xf32>
    %90 = vector.extract_strided_slice %29 {offsets = [0, 48], sizes = [8, 8], strides = [1, 1]} : vector<8x96xf32> to vector<8x8xf32>
    %91 = vector.extract_strided_slice %29 {offsets = [0, 80], sizes = [8, 8], strides = [1, 1]} : vector<8x96xf32> to vector<8x8xf32>
    %92 = arith.truncf %89 : vector<8x8xf32> to vector<8x8xbf16>
    %93 = arith.truncf %90 : vector<8x8xf32> to vector<8x8xbf16>
    %cst_35 = arith.constant dense<0.000000e+00> : vector<8x8xf32>
    %94 = tpu.matmul %92, %93, %cst_35 {dimension_numbers = #tpu.dot_dimension_numbers<[1], [1], [0], [0], [0, 0, 1, 0], [], []>} : vector<8x8xbf16>, vector<8x8xbf16>, vector<8x8xf32> -> vector<8x8xf32>
    %95 = vector.broadcast %31 : vector<1x8xf32> to vector<8x8xf32>
    %96 = arith.addf %94, %95 : vector<8x8xf32>
    %cst_36 = arith.constant dense<0xFF800000> : vector<8xf32>
    %97 = vector.multi_reduction <maximumf>, %96, %cst_36 [1] : vector<8x8xf32> to vector<8xf32>
    %98 = vector.shape_cast %97 : vector<8xf32> to vector<8x1xf32>
    %99 = vector.broadcast %98 : vector<8x1xf32> to vector<8x8xf32>
    %100 = arith.subf %96, %99 : vector<8x8xf32>
    %101 = math.exp %100 : vector<8x8xf32>
    %cst_37 = arith.constant dense<0.000000e+00> : vector<8xf32>
    %102 = vector.multi_reduction <add>, %101, %cst_37 [1] : vector<8x8xf32> to vector<8xf32>
    %103 = vector.shape_cast %102 : vector<8xf32> to vector<8x1xf32>
    %104 = arith.truncf %101 : vector<8x8xf32> to vector<8x8xbf16>
    %105 = arith.truncf %91 : vector<8x8xf32> to vector<8x8xbf16>
    %cst_38 = arith.constant dense<0.000000e+00> : vector<8x8xf32>
    %106 = tpu.matmul %104, %105, %cst_38 {dimension_numbers = #tpu.dot_dimension_numbers<[1], [0], [0], [1], [0, 0, 1, 1], [], []>} : vector<8x8xbf16>, vector<8x8xbf16>, vector<8x8xf32> -> vector<8x8xf32>
    %107 = tpu.reciprocal %103 {approx = true} : vector<8x1xf32> -> vector<8x1xf32>
    %108 = vector.broadcast %107 : vector<8x1xf32> to vector<8x8xf32>
    %109 = arith.mulf %106, %108 : vector<8x8xf32>
    %110 = arith.truncf %109 : vector<8x8xf32> to vector<8x8xbf16>
    %c16 = arith.constant 16 : index
    %c0_39 = arith.constant 0 : index
    %111 = vector.load %arg7[%c16, %c0_39] : memref<32x32xbf16, #tpu.memory_space<vmem>>, vector<8x32xbf16>
    %cst_40 = arith.constant dense<0.000000e+00> : vector<8x32xf32>
    %112 = tpu.matmul %110, %111, %cst_40 {dimension_numbers = #tpu.dot_dimension_numbers<[1], [0], [0], [1], [0, 0, 1, 1], [], []>} : vector<8x8xbf16>, vector<8x32xbf16>, vector<8x32xf32> -> vector<8x32xf32>
    %113 = arith.addf %86, %112 : vector<8x32xf32>
    %114 = vector.extract_strided_slice %29 {offsets = [0, 24], sizes = [8, 8], strides = [1, 1]} : vector<8x96xf32> to vector<8x8xf32>
    %cst_41 = arith.constant 0.353553385 : f32
    %115 = vector.broadcast %cst_41 : f32 to vector<8x8xf32>
    %116 = arith.mulf %114, %115 : vector<8x8xf32>
    %117 = vector.extract_strided_slice %29 {offsets = [0, 56], sizes = [8, 8], strides = [1, 1]} : vector<8x96xf32> to vector<8x8xf32>
    %118 = vector.extract_strided_slice %29 {offsets = [0, 88], sizes = [8, 8], strides = [1, 1]} : vector<8x96xf32> to vector<8x8xf32>
    %119 = arith.truncf %116 : vector<8x8xf32> to vector<8x8xbf16>
    %120 = arith.truncf %117 : vector<8x8xf32> to vector<8x8xbf16>
    %cst_42 = arith.constant dense<0.000000e+00> : vector<8x8xf32>
    %121 = tpu.matmul %119, %120, %cst_42 {dimension_numbers = #tpu.dot_dimension_numbers<[1], [1], [0], [0], [0, 0, 1, 0], [], []>} : vector<8x8xbf16>, vector<8x8xbf16>, vector<8x8xf32> -> vector<8x8xf32>
    %122 = vector.broadcast %31 : vector<1x8xf32> to vector<8x8xf32>
    %123 = arith.addf %121, %122 : vector<8x8xf32>
    %cst_43 = arith.constant dense<0xFF800000> : vector<8xf32>
    %124 = vector.multi_reduction <maximumf>, %123, %cst_43 [1] : vector<8x8xf32> to vector<8xf32>
    %125 = vector.shape_cast %124 : vector<8xf32> to vector<8x1xf32>
    %126 = vector.broadcast %125 : vector<8x1xf32> to vector<8x8xf32>
    %127 = arith.subf %123, %126 : vector<8x8xf32>
    %128 = math.exp %127 : vector<8x8xf32>
    %cst_44 = arith.constant dense<0.000000e+00> : vector<8xf32>
    %129 = vector.multi_reduction <add>, %128, %cst_44 [1] : vector<8x8xf32> to vector<8xf32>
    %130 = vector.shape_cast %129 : vector<8xf32> to vector<8x1xf32>
    %131 = arith.truncf %128 : vector<8x8xf32> to vector<8x8xbf16>
    %132 = arith.truncf %118 : vector<8x8xf32> to vector<8x8xbf16>
    %cst_45 = arith.constant dense<0.000000e+00> : vector<8x8xf32>
    %133 = tpu.matmul %131, %132, %cst_45 {dimension_numbers = #tpu.dot_dimension_numbers<[1], [0], [0], [1], [0, 0, 1, 1], [], []>} : vector<8x8xbf16>, vector<8x8xbf16>, vector<8x8xf32> -> vector<8x8xf32>
    %134 = tpu.reciprocal %130 {approx = true} : vector<8x1xf32> -> vector<8x1xf32>
    %135 = vector.broadcast %134 : vector<8x1xf32> to vector<8x8xf32>
    %136 = arith.mulf %133, %135 : vector<8x8xf32>
    %137 = arith.truncf %136 : vector<8x8xf32> to vector<8x8xbf16>
    %c24 = arith.constant 24 : index
    %c0_46 = arith.constant 0 : index
    %138 = vector.load %arg7[%c24, %c0_46] : memref<32x32xbf16, #tpu.memory_space<vmem>>, vector<8x32xbf16>
    %cst_47 = arith.constant dense<0.000000e+00> : vector<8x32xf32>
    %139 = tpu.matmul %137, %138, %cst_47 {dimension_numbers = #tpu.dot_dimension_numbers<[1], [0], [0], [1], [0, 0, 1, 1], [], []>} : vector<8x8xbf16>, vector<8x32xbf16>, vector<8x32xf32> -> vector<8x32xf32>
    %140 = arith.addf %113, %139 : vector<8x32xf32>
    %141 = arith.addf %1, %140 : vector<8x32xf32>
    %c0_48 = arith.constant 0 : index
    %c0_49 = arith.constant 0 : index
    %142 = vector.load %arg8[%c0_48, %c0_49] : memref<1x32xf32, #tpu.memory_space<vmem>>, vector<1x32xf32>
    %143 = vector.broadcast %142 : vector<1x32xf32> to vector<8x32xf32>
    %144 = arith.addf %141, %143 : vector<8x32xf32>
    %c0_50 = arith.constant 0 : index
    %c0_51 = arith.constant 0 : index
    %145 = vector.load %arg9[%c0_50, %c0_51] : memref<1x32xf32, #tpu.memory_space<vmem>>, vector<1x32xf32>
    %c0_52 = arith.constant 0 : index
    %c0_53 = arith.constant 0 : index
    %146 = vector.load %arg10[%c0_52, %c0_53] : memref<1x32xf32, #tpu.memory_space<vmem>>, vector<1x32xf32>
    %cst_54 = arith.constant dense<0.000000e+00> : vector<8xf32>
    %147 = vector.multi_reduction <add>, %144, %cst_54 [1] : vector<8x32xf32> to vector<8xf32>
    %148 = vector.shape_cast %147 : vector<8xf32> to vector<8x1xf32>
    %cst_55 = arith.constant 3.200000e+01 : f32
    %149 = vector.broadcast %cst_55 : f32 to vector<8x1xf32>
    %150 = arith.divf %148, %149 : vector<8x1xf32>
    %151 = vector.broadcast %150 : vector<8x1xf32> to vector<8x32xf32>
    %152 = arith.subf %144, %151 : vector<8x32xf32>
    %153 = arith.mulf %152, %152 : vector<8x32xf32>
    %cst_56 = arith.constant dense<0.000000e+00> : vector<8xf32>
    %154 = vector.multi_reduction <add>, %153, %cst_56 [1] : vector<8x32xf32> to vector<8xf32>
    %155 = vector.shape_cast %154 : vector<8xf32> to vector<8x1xf32>
    %cst_57 = arith.constant 3.200000e+01 : f32
    %156 = vector.broadcast %cst_57 : f32 to vector<8x1xf32>
    %157 = arith.divf %155, %156 : vector<8x1xf32>
    %cst_58 = arith.constant 9.99999974E-6 : f32
    %158 = vector.broadcast %cst_58 : f32 to vector<8x1xf32>
    %159 = arith.addf %157, %158 : vector<8x1xf32>
    %160 = math.rsqrt %159 : vector<8x1xf32>
    %161 = vector.broadcast %160 : vector<8x1xf32> to vector<8x32xf32>
    %162 = arith.mulf %152, %161 : vector<8x32xf32>
    %163 = vector.broadcast %145 : vector<1x32xf32> to vector<8x32xf32>
    %164 = arith.mulf %162, %163 : vector<8x32xf32>
    %165 = vector.broadcast %146 : vector<1x32xf32> to vector<8x32xf32>
    %166 = arith.addf %164, %165 : vector<8x32xf32>
    %167 = arith.truncf %166 : vector<8x32xf32> to vector<8x32xbf16>
    %c0_59 = arith.constant 0 : index
    %c0_60 = arith.constant 0 : index
    %168 = vector.load %arg11[%c0_59, %c0_60] : memref<32x64xbf16, #tpu.memory_space<vmem>>, vector<32x64xbf16>
    %cst_61 = arith.constant dense<0.000000e+00> : vector<8x64xf32>
    %169 = tpu.matmul %167, %168, %cst_61 {dimension_numbers = #tpu.dot_dimension_numbers<[1], [0], [0], [1], [0, 0, 1, 1], [], []>} : vector<8x32xbf16>, vector<32x64xbf16>, vector<8x64xf32> -> vector<8x64xf32>
    %c0_62 = arith.constant 0 : index
    %c0_63 = arith.constant 0 : index
    %170 = vector.load %arg12[%c0_62, %c0_63] : memref<1x64xf32, #tpu.memory_space<vmem>>, vector<1x64xf32>
    %171 = vector.broadcast %170 : vector<1x64xf32> to vector<8x64xf32>
    %172 = arith.addf %169, %171 : vector<8x64xf32>
    %cst_64 = arith.constant 0.000000e+00 : f32
    %173 = vector.broadcast %cst_64 : f32 to vector<8x64xf32>
    %174 = arith.maximumf %172, %173 : vector<8x64xf32>
    %175 = arith.truncf %174 : vector<8x64xf32> to vector<8x64xbf16>
    %c0_65 = arith.constant 0 : index
    %c0_66 = arith.constant 0 : index
    %176 = vector.load %arg13[%c0_65, %c0_66] : memref<64x32xbf16, #tpu.memory_space<vmem>>, vector<64x32xbf16>
    %cst_67 = arith.constant dense<0.000000e+00> : vector<8x32xf32>
    %177 = tpu.matmul %175, %176, %cst_67 {dimension_numbers = #tpu.dot_dimension_numbers<[1], [0], [0], [1], [0, 0, 1, 1], [], []>} : vector<8x64xbf16>, vector<64x32xbf16>, vector<8x32xf32> -> vector<8x32xf32>
    %178 = arith.addf %144, %177 : vector<8x32xf32>
    %c0_68 = arith.constant 0 : index
    %c0_69 = arith.constant 0 : index
    %179 = vector.load %arg14[%c0_68, %c0_69] : memref<1x32xf32, #tpu.memory_space<vmem>>, vector<1x32xf32>
    %180 = vector.broadcast %179 : vector<1x32xf32> to vector<8x32xf32>
    %181 = arith.addf %178, %180 : vector<8x32xf32>
    %c0_70 = arith.constant 0 : index
    %c0_71 = arith.constant 0 : index
    %c0_72 = arith.constant 0 : index
    %182 = vector.load %arg15[%c0_70, %c0_71, %c0_72] : memref<1x8x32xf32, #tpu.memory_space<vmem>>, vector<1x8x32xf32>
    %183 = vector.shape_cast %182 : vector<1x8x32xf32> to vector<8x32xf32>
    %184 = vector.shape_cast %181 : vector<8x32xf32> to vector<1x8x32xf32>
    tpu.vector_store %arg15[%c0_70, %c0_71, %c0_72], %184 {strides = array<i32>} : memref<1x8x32xf32, #tpu.memory_space<vmem>>, vector<1x8x32xf32>,
    return
  }
  func.func @transform_0(%arg0: i32) -> (i32, i32, i32) {
    %c0_i32 = arith.constant 0 : i32
    %c0_i32_0 = arith.constant 0 : i32
    %c0_i32_1 = arith.constant 0 : i32
    return %arg0, %c0_i32, %c0_i32_0 : i32, i32, i32
  }
  func.func @transform_1(%arg0: i32) -> (i32, i32, i32) {
    %c0_i32 = arith.constant 0 : i32
    %c0_i32_0 = arith.constant 0 : i32
    %c0_i32_1 = arith.constant 0 : i32
    return %arg0, %c0_i32, %c0_i32_0 : i32, i32, i32
  }
  func.func @transform_2(%arg0: i32) -> (i32, i32) {
    %c0_i32 = arith.constant 0 : i32
    %c0_i32_0 = arith.constant 0 : i32
    %c0_i32_1 = arith.constant 0 : i32
    return %c0_i32, %c0_i32_0 : i32, i32
  }
  func.func @transform_3(%arg0: i32) -> (i32, i32) {
    %c0_i32 = arith.constant 0 : i32
    %c0_i32_0 = arith.constant 0 : i32
    %c0_i32_1 = arith.constant 0 : i32
    return %c0_i32, %c0_i32_0 : i32, i32
  }
  func.func @transform_4(%arg0: i32) -> (i32, i32) {
    %c0_i32 = arith.constant 0 : i32
    %c0_i32_0 = arith.constant 0 : i32
    %c0_i32_1 = arith.constant 0 : i32
    return %c0_i32, %c0_i32_0 : i32, i32
  }
  func.func @transform_5(%arg0: i32) -> (i32, i32) {
    %c0_i32 = arith.constant 0 : i32
    %c0_i32_0 = arith.constant 0 : i32
    %c0_i32_1 = arith.constant 0 : i32
    return %c0_i32, %c0_i32_0 : i32, i32
  }
  func.func @transform_6(%arg0: i32) -> (i32, i32) {
    %c0_i32 = arith.constant 0 : i32
    %c0_i32_0 = arith.constant 0 : i32
    %c0_i32_1 = arith.constant 0 : i32
    return %c0_i32, %c0_i32_0 : i32, i32
  }
  func.func @transform_7(%arg0: i32) -> (i32, i32) {
    %c0_i32 = arith.constant 0 : i32
    %c0_i32_0 = arith.constant 0 : i32
    %c0_i32_1 = arith.constant 0 : i32
    return %c0_i32, %c0_i32_0 : i32, i32
  }
  func.func @transform_8(%arg0: i32) -> (i32, i32) {
    %c0_i32 = arith.constant 0 : i32
    %c0_i32_0 = arith.constant 0 : i32
    %c0_i32_1 = arith.constant 0 : i32
    return %c0_i32, %c0_i32_0 : i32, i32
  }
  func.func @transform_9(%arg0: i32) -> (i32, i32) {
    %c0_i32 = arith.constant 0 : i32
    %c0_i32_0 = arith.constant 0 : i32
    %c0_i32_1 = arith.constant 0 : i32
    return %c0_i32, %c0_i32_0 : i32, i32
  }
  func.func @transform_10(%arg0: i32) -> (i32, i32) {
    %c0_i32 = arith.constant 0 : i32
    %c0_i32_0 = arith.constant 0 : i32
    %c0_i32_1 = arith.constant 0 : i32
    return %c0_i32, %c0_i32_0 : i32, i32
  }
  func.func @transform_11(%arg0: i32) -> (i32, i32) {
    %c0_i32 = arith.constant 0 : i32
    %c0_i32_0 = arith.constant 0 : i32
    %c0_i32_1 = arith.constant 0 : i32
    return %c0_i32, %c0_i32_0 : i32, i32
  }
  func.func @transform_12(%arg0: i32) -> (i32, i32) {
    %c0_i32 = arith.constant 0 : i32
    %c0_i32_0 = arith.constant 0 : i32
    %c0_i32_1 = arith.constant 0 : i32
    return %c0_i32, %c0_i32_0 : i32, i32
  }
  func.func @transform_13(%arg0: i32) -> (i32, i32) {
    %c0_i32 = arith.constant 0 : i32
    %c0_i32_0 = arith.constant 0 : i32
    %c0_i32_1 = arith.constant 0 : i32
    return %c0_i32, %c0_i32_0 : i32, i32
  }
  func.func @transform_14(%arg0: i32) -> (i32, i32, i32) {
    %c0_i32 = arith.constant 0 : i32
    %c0_i32_0 = arith.constant 0 : i32
    %c0_i32_1 = arith.constant 0 : i32
    return %arg0, %c0_i32, %c0_i32_0 : i32, i32, i32
  }
}

</mosaic_0001>

<bundles_post_ra>
// kernel: tpu_custom_call.1
= control target key start
LH: loop header
LB: loop body
LE: loop exit
PB: predicated region body
PF: predicated region fallthrough
CT: control target
= control target key end

     0   :  { %s1829_s0 = inlined_call_operand.hbm [shape: f32[8,8,32], index: 0, kind: input, shape index: {}]   ;;  %s1830_s1 = inlined_call_operand.hbm [shape: f32[8,1,8], index: 1, kind: input, shape index: {}]   ;;  %s1831_s2 = inlined_call_operand.vmem [shape: f32[1,32], index: 2, kind: input, shape index: {}]   ;;  %s1832_s3 = inlined_call_operand.vmem [shape: f32[1,32], index: 3, kind: input, shape index: {}]   ;;  %s1833_s4 = inlined_call_operand.vmem [shape: bf16[32,96], index: 4, kind: input, shape index: {}]   ;;  %s1834_s5 = inlined_call_operand.vmem [shape: f32[1,96], index: 5, kind: input, shape index: {}]   ;;  %s1835_s6 = inlined_call_operand.vmem [shape: bf16[32,32], index: 6, kind: input, shape index: {}]   ;;  %s1836_s7 = inlined_call_operand.vmem [shape: f32[1,32], index: 7, kind: input, shape index: {}]   ;;  %s1837_s8 = inlined_call_operand.vmem [shape: f32[1,32], index: 8, kind: input, shape index: {}]   ;;  %s1838_s9 = inlined_call_operand.vmem [shape: f32[1,32], index: 9, kind: input, shape index: {}]   ;;  %s1839_s10 = inlined_call_operand.vmem [shape: bf16[32,64], index: 10, kind: input, shape index: {}]   ;;  %s1840_s11 = inlined_call_operand.vmem [shape: f32[1,64], index: 11, kind: input, shape index: {}]   ;;  %s1841_s12 = inlined_call_operand.vmem [shape: bf16[64,32], index: 12, kind: input, shape index: {}]   ;;  %s1842_s13 = inlined_call_operand.vmem [shape: f32[1,32], index: 13, kind: input, shape index: {}]   ;;  %s1843_s14 = inlined_call_operand.hbm [shape: f32[8,8,32], index: 14, kind: output, shape index: {}]  }
   0x1   :  { %1852 = sst [smem:[#allocation17_spill]] %s1829_s0 }
   0x2   :  { %1853 = sst [smem:[#allocation18_spill]] %s1842_s13 }
   0x3   :  { %1854 = sst [smem:[#allocation19_spill]] %s1843_s14 }
   0x4   :  { %19 = vsyncpa [#allocation3], 0 }
   0x5   :  { %21 = vsyncpa [#allocation3 + $0x1], 0 }
   0x6   :  { %22 = vsyncpa [#allocation6], 0 }
   0x7   :  { %24 = vsyncpa [#allocation6 + $0x1], 0 }
   0x8   :  { %25 = vsyncpa [#allocation4], 0 }
   0x9   :  { %27 = vsyncpa [#allocation4 + $0x1], 0  ;;  %s1536_s29 = smov 0   ;;  %s1538_s30 = smov 0  }
   0xa   :  { %s1540_s15 = smov 0   ;;  %s1542_s16 = smov 0  }
   0xb LB: > { %1855 = sst [smem:[#allocation11_spill]] %s1435_s29  ;;  %s1557_s17 = sadd.s32 4294967295, %s1447_s16   ;;  %s1447_s16 = sphi %s1542_s16, %s1873_s16   ;;  %s1443_s15 = sphi %s1540_s15, %s1875_s15   ;;  %s1439_s30 = sphi %s1538_s30, %s1877_s30   ;;  %s1435_s29 = sphi %s1536_s29, %s1876_s29  }
   0xc   : > { %1856 = sst [smem:[#allocation12_spill]] %s1443_s15  ;;  %s1156_s18 = sadd.s32 4294967294, %s1447_s16  }
   0xd   : > { %s1561_s19 = sadd.s32 1, %s1447_s16   ;;  %s40_s20 = sadd.s32 1, %s1443_s15 }
   0xe   : > { %1857 = sst [smem:[#allocation13_spill]] %s1561_s19  ;;  %s37_s21 = ssub.s32 %s1447_s16, %s1561_s19 }
   0xf   : > { %p47_p0 = scmp.ne.s32.totalorder %s1443_s15, %s1439_s30  ;;  %p38_p1 = scmp.eq.s32.totalorder %s37_s21, 0 }
  0x10   : > { %p48_p2 = scmp.eq.s32.totalorder %s1447_s16, 0  ;;  %p53_p3 = scmp.ne.s32.totalorder %s1439_s30, %s1435_s29 }
  0x11   : > { %p54_p4 = scmp.eq.s32.totalorder %s1557_s17, 0  ;;  %p355_p7 = scmp.eq.s32.totalorder %s1557_s17, 7 }
  0x12   : > { %s1573_s22 = scalar_select %p38_p1, %s1443_s15, %s40_s20  }
  0x13   : > { %p1575_p5 = por %p48_p2, %p47_p0  ;;  %p1579_p6 = por %p54_p4, %p53_p3 }
  0x14   : > { %1858 = sst [smem:[#allocation14_spill]] %s1573_s22  ;;  %p361_p8 = scmp.eq.s32.totalorder %s1156_s18, 7 }
  0x15   : > { %p1240_p9 = scmp.lt.s32.totalorder %s1447_s16, 8  ;;  %p1585_p10 = por %p355_p7, %p47_p0 }
  0x16   : > { %p1589_p11 = por %p361_p8, %p53_p3  ;;  %s1594_s27 = sand.u32 1, %s1443_s15  }
  0x17   : > { %s1861_s25 = scalar_select %p1585_p10, 1, 0 }
  0x18   : > { %s1863_s26 = scalar_select %p1589_p11, 1, 0 }
  0x19   : > { %1862 = sst [smem:[#allocation15_spill]] %s1861_s25  ;;  %s1160_s28 = sshll.u32 %s1447_s16, 3 }
  0x1a   : > { %1864 = sst [smem:[#allocation16_spill]] %s1863_s26  ;;  %s1159_s20 = sshll.u32 %s1594_s27, 3 }
  0x1b   : > { %s1865_s0 = sld [smem:[#allocation17_spill]]  ;;  %s421_s29 = scalar_lea.vmem [#allocation2], %s1159_s20 }
  0x1c   : > { %s429_s13 = sshll.u32 %s421_s29, 4  ;;  %p1603_p12 = pnand %p1240_p9, %p1575_p5  ;;  %s430_s13 = int_to_ptr.vmem [resolvable:$true] %s429_s13 }
  0x1d   : > { %p1161_p13 = scmp.ge.s32.totalorder %s1447_s16, 1  ;;  %p451_p0 = scmp.lt.s32.totalorder %s1447_s16, 9 }
  0x1e   : > { %s418_s15 = scalar_lea.sflag [#allocation3], %s1594_s27  ;;  %p1321_p2 = pneg %p1603_p12 }
  0x21   : > { %s425_s19 = scalar_lea.hbm %s1865_s0, %s1160_s28  ;;  %s1324_s22 = scalar_lea.hbm %s1865_s0, 64 }
  0x22   : > { %s427_s18 = sshll.u32 %s425_s19, 4  ;;  %s428_s18 = int_to_ptr.hbm [resolvable:$true] %s427_s18 }
  0x23   : > { %s1317_s26 = sshra.s32 %s428_s18, 4  ;;  %s1318_s26 = int_to_ptr.hbm [resolvable:$true] %s1317_s26 }
  0x24   : > { %s1319_s14 = scalar_lea.hbm %s1318_s26, 8  ;;  %p1325_p5 = scmp.lt.s32.totalorder %s1318_s26, %s1865_s0 }
  0x25   : > { %p1320_p1 = scmp.ne.s32.totalorder %s1318_s26, %s1319_s14  ;;  %p1326_p7 = scmp.lt.s32.totalorder %s1324_s22, %s1319_s14 }
  0x27   : > { %p1322_p3 = pnand %p1321_p2, %p1320_p1  ;;  %p1327_p8 = por %p1326_p7, %p1325_p5 }
  0x29   : > { %p1323_p4 = pneg %p1322_p3 }
  0x2b   : > { %p1328_p9 = pnand %p1327_p8, %p1323_p4 }
  0x2d   : > { %1331 = shalt.err (!%p1328_p9)
}
  0x2e   : > { %1232 = dma.hbm_to_vmem [thread:$0]  (!%p1603_p12), %s428_s18, 128, %s430_s13, %s418_s15  }
  0x2f   : > { %p1627_p1 = pnand %p1161_p13, %p451_p0  ;;  %s442_s21 = scalar_lea.hbm %s1830_s1, %s1447_s16 }
  0x30   : > { %s444_s29 = sshll.u32 %s442_s21, 4  ;;  %s439_s19 = scalar_lea.vmem [#allocation5], %s1594_s27  ;;  %s445_s29 = int_to_ptr.hbm [resolvable:$true] %s444_s29 }
  0x31   : > { %s446_s22 = sshll.u32 %s439_s19, 4  ;;  %s437_s23 = scalar_lea.sflag [#allocation6], %s1594_s27  ;;  %s447_s22 = int_to_ptr.vmem [resolvable:$true] %s446_s22 }
  0x32   : > { %s1347_s28 = sshra.s32 %s445_s29, 4  ;;  %s1354_s18 = scalar_lea.hbm %s1830_s1, 8  ;;  %s1348_s28 = int_to_ptr.hbm [resolvable:$true] %s1347_s28 }
  0x33   : > { %s1349_s0 = scalar_lea.hbm %s1348_s28, 1  ;;  %p1355_p4 = scmp.lt.s32.totalorder %s1348_s28, %s1830_s1 }
  0x34   : > { %p1350_p3 = scmp.ne.s32.totalorder %s1348_s28, %s1349_s0  ;;  %p1356_p5 = scmp.lt.s32.totalorder %s1354_s18, %s1349_s0 }
  0x36   : > { %p1352_p13 = pnand %p1350_p3, %p1321_p2  ;;  %p1357_p7 = por %p1356_p5, %p1355_p4 }
  0x38   : > { %p1353_p0 = pneg %p1352_p13 }
  0x3a   : > { %p1358_p8 = pnand %p1357_p7, %p1353_p0 }
  0x3c   : > { %1361 = shalt.err (!%p1358_p8)
}
  0x3d   : > { %1235 = dma.hbm_to_vmem [thread:$0]  (!%p1603_p12), %s445_s29, 16, %s447_s22, %s437_s23  }
  0x3e   : > { %455 = sbr.rel (%p1627_p1) target bundleno = 2084 (0x824), region = 76  ;;  %s1651_s27 = sand.u32 (!%p1627_p1), 1, %s1439_s30  }
  0x3f   : > { %s1162_s21 = sshll.u32 (!%p1627_p1), %s1651_s27, 3  ;;  %s458_s19 = scalar_lea.sflag (!%p1627_p1), [#allocation3], %s1651_s27 }
  0x40   : > { %s461_s0 = scalar_lea.vmem (!%p1627_p1), [#allocation2], %s1162_s21 }
  0x43   : > { %1422 = dma.done.wait (%p1579_p6), %s458_s19, 128  }
  0x44   : > { %1424 = vsyncadd (%p1579_p6), %s458_s19, 4294967168  ;;  %s468_s25 = scalar_lea.sflag [#allocation6], %s1651_s27  ;;  %s470_s20 = scalar_lea.vmem [#allocation5], %s1651_s27 }
  0x45   : > { %1426 = dma.done.wait (%p1579_p6), %s468_s25, 16  }
  0x46   : > { %1428 = vsyncadd (%p1579_p6), %s468_s25, 4294967280  ;;  %vm524_vm0 = vcmask 261120   ;;  %v1667_v0 = vld [vmem:[%s461_s0] sm:$0xff]  ;;  %v1449_v2 = vmov 32.0   ;;  %s1450_s19 = smov 88   ;;  %s1451_s0 = smov 64  }
  0x47   : > { %v525_v1 = vsel %vm524_vm0, %v1667_v0, 0.0  ;;  %1295 = vrcp.f32 %v1449_v2  ;;  %v1216_v14 = vld [vmem:[%s1833_s4 + $0x8] sm:$0xff]  ;;  %v1215_v15 = vld [vmem:[%s1833_s4] sm:$0xff]  ;;  %s1452_s25 = smov 96   ;;  %s1453_s24 = smov 120   ;;  %vm644_vm5 = vcmask 1043456  }
  0x48   : > { %526 = vadd.xlane.f32.xlu0 %v525_v1  ;;  %592 = vmatpush.bf16.msra.mxu0 %v1216_v14  ;;  %v1286_v25 = vld [vmem:[%s1831_s2] ss:$0 sm:$0xff]  ;;  %s1454_s29 = smov 80   ;;  %s1455_s22 = smov 104   ;;  %vm609_vm6 = vcmask 64512   ;;  %vm1027_vm10 = vcmask 523264  }
  0x49   : > { %v1287_v28 = vld [vmem:[%s1832_s3] ss:$0 sm:$0xff]  ;;  %s1456_s23 = smov 112   ;;  %s1457_s28 = smov 40  }
  0x4a   : > { %v1288_v32 = vld [vmem:[%s1834_s5] ss:$0 sm:$0xff]  ;;  %s1459_s13 = smov 56   ;;  %s1212_s18 = sshll.u32 %s1557_s17, 3 }
  0x4b   : > { %v1707_v48 = vld [vmem:[%s470_s20] ss:$0 sm:$0xff]  ;;  %s1458_s20 = smov 72   ;;  %s1052_s17 = scalar_lea.sflag [#allocation4], %s1651_s27 }
  0x4c   : > { %593 = vmatpush.bf16.msra.mxu0 %v1215_v15 }
  0x4d   : > { %v1296_v3 = vpop.eup %1295 }
  0x4e   : > { %v529_v4 = vmul.f32 32.0, %v1296_v3  ;;  %vm533_vm1 = vweird.f32 %v1296_v3 }
  0x50   : > { %v530_v5 = vsub.f32 1.0, %v529_v4 }
  0x52   : > { %v531_v6 = vmul.f32 %v1296_v3, %v530_v5 }
  0x54   : > { %v532_v7 = vadd.f32 %v1296_v3, %v531_v6 }
  0x56   : > { %v1671_v8 = vsel %vm533_vm1, %v1296_v3, %v532_v7 }
  0xbb   : > { %v527_v9 = vpop.xlane.xlu0 %526 }
  0xbc   : > { %v535_v10 = vmul.f32 %v1671_v8, %v527_v9 }
  0xbe   : > { %v536_v11 = vsub.f32 %v1667_v0, %v535_v10  ;;  %v664_v10 = vld [vmem:[%s1835_s6] sm:$0xf] }
  0xc0   : > { %v537_v12 = vmul.f32 %v536_v11, %v536_v11 }
  0xc2   : > { %v538_v13 = vsel %vm524_vm0, %v537_v12, 0.0 }
  0xc3   : > { %539 = vadd.xlane.f32.xlu0 %v538_v13 }
 0x136   : > { %v540_v16 = vpop.xlane.xlu0 %539 }
 0x137   : > { %v541_v17 = vmul.f32 %v540_v16, %v1671_v8 }
 0x139   : > { %v542_v18 = vadd.f32 1e-05, %v541_v17 }
 0x13b   : > { %1297 = vrsqrt.f32 %v542_v18  ;;  %vm549_vm3 = vweird.f32 %v542_v18 }
 0x141   : > { %v1298_v19 = vpop.eup %1297 }
 0x142   : > { %v544_v20 = vmul.f32 %v1298_v19, %v542_v18  ;;  %vm550_vm2 = vweird.f32 %v1298_v19 }
 0x143   : > { %vm551_vm4 = vmor %vm549_vm3, %vm550_vm2 }
 0x144   : > { %v545_v21 = vmul.f32 %v1298_v19, %v544_v20 }
 0x146   : > { %v546_v22 = vmul.f32 0.5, %v545_v21 }
 0x148   : > { %v547_v23 = vsub.f32 1.5, %v546_v22 }
 0x14a   : > { %v548_v24 = vmul.f32 %v1298_v19, %v547_v23 }
 0x14c   : > { %v552_v26 = vsel %vm551_vm4, %v1298_v19, %v548_v24 }
 0x14d   : > { %v553_v27 = vmul.f32 %v552_v26, %v536_v11  ;;  %v747_v11 = vsel %vm644_vm5, %v664_v10, 0 }
 0x14f   : > { %v557_v29 = vmul.f32 %v1286_v25, %v553_v27  ;;  %v723_v27 = vld [vmem:[%s1835_s6 + $0x4] sm:$0xf] }
 0x151   : > { %v561_v30 = vadd.f32 %v1287_v28, %v557_v29  ;;  %v728_v28 = vsel %vm644_vm5, %v723_v27, 0  ;;  %v1218_v27 = vld [vmem:[%s1839_s10 + $0x8] sm:$0xff] }
 0x152   : > { %737 = vmatpush.bf16.msrb.mxu0 %v728_v28  ;;  %v1222_v28 = vld [vmem:[%s1841_s12 + $0x18] sm:$0xff] }
 0x153   : > { %v562_v31 = vpack.c.bf16 %v561_v30, %v561_v30 }
 0x155   : > { %1172 = vmatmul.msk.bf16.vlgmr.msra.gmra.mxu0 %vm524_vm0, %v562_v31 }
 0x1d2   : > { %v595_v33 = vpop.f32.mrf.mxu0 }
 0x1d3   : > { %v596_v34 = vadd.f32 %v1288_v32, %v595_v33 }
 0x1d5   : > { %v1693_v35 = vpack.c.bf16 %v596_v34, %v596_v34  ;;  %v600_v36 = vmul.f32 0.35355338, %v596_v34 }
 0x1d7   : > { %668 = vrot.lane.b32.xlu0 %v1693_v35, %s1450_s19  ;;  %639 = vrot.lane.b32.xlu2 %v1693_v35, %s1451_s0  ;;  %v601_v38 = vpack.c.bf16 %v600_v36, %v600_v36  ;;  %s1460_s19 = smov 48  }
 0x1d8   : > { %607 = vrot.lane.b32.xlu1 %v1693_v35, %s1452_s25 }
 0x1da   : > { %v597_v37 = vpop.f32.mrf.mxu0 }
 0x1df   : > { %666 = vrot.lane.b32.xlu0 %v601_v38, %s1453_s24 }
 0x1e7   : > { %764 = vrot.lane.b32.xlu0 %v1693_v35, %s1454_s29  ;;  %s1869_s29 = sld [smem:[#allocation18_spill]] }
 0x1ef   : > { %840 = vrot.lane.b32.xlu0 %v601_v38, %s1455_s22 }
 0x231   : > { %v640_v39 = vpop.permute.xlu2 %639 }
 0x232   : > { %v646_v40 = vsel %vm644_vm5, %v640_v39, 0 }
 0x233   : > { %655 = vmatpush.bf16.msra.mxu2 %v646_v40 }
 0x249   : > { %v669_v41 = vpop.permute.xlu0 %668 }
 0x24a   : > { %v608_v42 = vpop.permute.xlu1 %607  ;;  %v674_v43 = vsel %vm609_vm6, %v669_v41, 0 }
 0x24b   : > { %v614_v44 = vsel %vm609_vm6, %v608_v42, 0  ;;  %683 = vmatpush.bf16.xpose.msra.mxu3 %v674_v43 }
 0x24c   : > { %623 = vmatpush.bf16.xpose.msra.mxu1 %v614_v44 }
 0x251   : > { %v667_v45 = vpop.permute.xlu0 %666 }
 0x252   : > { %1175 = vmatmul.msk.bf16.vlgmr.msra.gmra.mxu3 %vm609_vm6, %v667_v45 }
 0x253   : > { %1173 = vmatmul.msk.bf16.vlgmr.msra.gmra.mxu1 %vm609_vm6, %v601_v38 }
 0x254   : > { %756 = vmatpush.bf16.msrb.mxu1 %v747_v11 }
 0x259   : > { %v765_v46 = vpop.permute.xlu0 %764 }
 0x25a   : > { %v770_v47 = vsel %vm609_vm6, %v765_v46, 0 }
 0x25b   : > { %779 = vmatpush.bf16.xpose.msrb.mxu3 %v770_v47 }
 0x261   : > { %v841_v57 = vpop.permute.xlu0 %840 }
 0x2d0   : > { %v625_v49 = vpop.f32.mrf.mxu1 }
 0x2d1   : > { %v626_v50 = vadd.f32 %v1707_v48, %v625_v49 }
 0x2d3   : > { %v629_v51 = vsel %vm609_vm6, %v626_v50, -inf }
 0x2d4   : > { %630 = vmax.xlane.f32.xlu1 %v629_v51 }
 0x2d5   : > { %v685_v52 = vpop.f32.mrf.mxu3 }
 0x2d6   : > { %v686_v53 = vadd.f32 %v1707_v48, %v685_v52 }
 0x2d8   : > { %v627_v54 = vpop.f32.mrf.mxu1  ;;  %v689_v55 = vsel %vm609_vm6, %v686_v53, -inf }
 0x2d9   : > { %690 = vmax.xlane.f32.xlu0 %v689_v55 }
 0x2dd   : > { %v687_v56 = vpop.f32.mrf.mxu3 }
 0x2ed   : > { %762 = vrot.lane.b32.xlu1 %v601_v38, %s1456_s23  ;;  %873 = vrot.lane.b32.xlu0 %v1693_v35, %s1457_s28  ;;  %s519_s23 = scalar_lea.vmem [#allocation7], %s1162_s21 }
 0x2ee   : > { %s1064_s28 = sshll.u32 %s519_s23, 4  ;;  %s1065_s28 = int_to_ptr.vmem [resolvable:$true] %s1064_s28 }
 0x347   : > { %v631_v58 = vpop.xlane.xlu1 %630 }
 0x348   : > { %v632_v59 = vsub.f32 %v626_v50, %v631_v58 }
 0x34a   : > { %v633_v60 = vmul.f32 1.442695, %v632_v59  ;;  %v819_v59 = vld [vmem:[%s1835_s6 + $0x8] sm:$0xf] }
 0x34c   : > { %1299 = vpow2.f32 %v633_v60  ;;  %v691_v61 = vpop.xlane.xlu0 %690  ;;  %v824_v60 = vsel %vm644_vm5, %v819_v59, 0 }
 0x34d   : > { %v692_v62 = vsub.f32 %v686_v53, %v691_v61  ;;  %833 = vmatpush.bf16.msra.mxu0 %v824_v60 }
 0x34f   : > { %v693_v63 = vmul.f32 1.442695, %v692_v62 }
 0x351   : > { %1301 = vpow2.f32 %v693_v63 }
 0x352   : > { %v1300_v1 = vpop.eup %1299 }
 0x353   : > { %v635_v2 = vsel %vm609_vm6, %v1300_v1, 0.0  ;;  %v638_v3 = vpack.c.bf16 %v1300_v1, %v1300_v1 }
 0x354   : > { %636 = vadd.xlane.f32.xlu2 %v635_v2 }
 0x355   : > { %1174 = vmatmul.msk.bf16.vlgmr.msra.gmra.mxu2 %vm609_vm6, %v638_v3 }
 0x357   : > { %v1302_v4 = vpop.eup %1301 }
 0x358   : > { %v695_v5 = vsel %vm609_vm6, %v1302_v4, 0.0  ;;  %v698_v20 = vpack.c.bf16 %v1302_v4, %v1302_v4 }
 0x359   : > { %696 = vadd.xlane.f32.xlu0 %v695_v5 }
 0x35f   : > { %v763_v6 = vpop.permute.xlu1 %762  ;;  %v874_v7 = vpop.permute.xlu0 %873 }
 0x360   : > { %v879_v9 = vsel %vm644_vm5, %v874_v7, 0  ;;  %1179 = vmatmul.msk.bf16.vlgmr.msrb.gmra.mxu3 %vm609_vm6, %v763_v6 }
 0x361   : > { %888 = vmatpush.bf16.msra.mxu3 %v879_v9 }
 0x36c   : > { %842 = vrot.lane.b32.xlu2 %v1693_v35, %s1458_s20 }
 0x374   : > { %699 = vrot.lane.b32.xlu2 %v1693_v35, %s1459_s13 }
 0x3c7   : > { %v637_v12 = vpop.xlane.xlu2 %636 }
 0x3c8   : > { %1303 = vrcp.f32 %v637_v12 }
 0x3cc   : > { %v697_v29 = vpop.xlane.xlu0 %696 }
 0x3cd   : > { %1305 = vrcp.f32 %v697_v29 }
 0x3ce   : > { %v1304_v16 = vpop.eup %1303 }
 0x3cf   : > { %v843_v13 = vpop.permute.xlu2 %842 }
 0x3d0   : > { %v848_v14 = vsel %vm609_vm6, %v843_v13, 0 }
 0x3d1   : > { %857 = vmatpush.bf16.xpose.msra.mxu1 %v848_v14 }
 0x3d3   : > { %v1306_v31 = vpop.eup %1305 }
 0x3d7   : > { %v700_v15 = vpop.permute.xlu2 %699 }
 0x3d8   : > { %v657_v17 = vpop.f32.mrf.mxu2  ;;  %v705_v18 = vsel %vm644_vm5, %v700_v15, 0 }
 0x3d9   : > { %v662_v19 = vmul.f32 %v1304_v16, %v657_v17  ;;  %714 = vmatpush.bf16.msrb.mxu2 %v705_v18  ;;  %v1290_v17 = vld [vmem:[%s1836_s7] ss:$0 sm:$0xff] }
 0x3db   : > { %v663_v21 = vpack.c.bf16 %v662_v19, %v662_v19 }
 0x3dc   : > { %1176 = vmatmul.msk.bf16.vlgmr.msrb.gmra.mxu2 %vm609_vm6, %v698_v20 }
 0x3dd   : > { %1178 = vmatmul.msk.bf16.vlgmr.msrb.gmra.mxu1 %vm609_vm6, %v663_v21 }
 0x3de   : > { %1035 = vmatpush.bf16.msrb.mxu1 %v1222_v28 }
 0x3e0   : > { %v659_v22 = vpop.f32.mrf.mxu2 }
 0x3e3   : > { %v781_v23 = vpop.f32.mrf.mxu3 }
 0x3e4   : > { %v782_v24 = vadd.f32 %v1707_v48, %v781_v23 }
 0x3e6   : > { %v785_v25 = vsel %vm609_vm6, %v782_v24, -inf }
 0x3e7   : > { %786 = vmax.xlane.f32.xlu2 %v785_v25 }
 0x3eb   : > { %v783_v26 = vpop.f32.mrf.mxu3 }
 0x3ed   : > { %1182 = vmatmul.msk.bf16.vlgmr.msra.gmra.mxu1 %vm609_vm6, %v841_v57  ;;  %v897_v57 = vld [vmem:[%s1835_s6 + $0xc] sm:$0xf] }
 0x3ee   : > { %v902_v58 = vsel %vm644_vm5, %v897_v57, 0 }
 0x45a   : > { %v758_v30 = vpop.f32.mrf.mxu1  ;;  %v787_v42 = vpop.xlane.xlu2 %786 }
 0x45b   : > { %v788_v46 = vsub.f32 %v782_v24, %v787_v42  ;;  %v1292_v42 = vld [vmem:[%s1838_s9] ss:$0 sm:$0xff] }
 0x45d   : > { %v789_v49 = vmul.f32 1.442695, %v788_v46  ;;  %v1220_v46 = vld [vmem:[%s1841_s12 + $0x8] sm:$0xff] }
 0x45f   : > { %v716_v32 = vpop.f32.mrf.mxu2 }
 0x460   : > { %v721_v33 = vmul.f32 %v1306_v31, %v716_v32  ;;  %v1221_v31 = vld [vmem:[%s1841_s12 + $0x10] sm:$0xff] }
 0x461   : > { %1036 = vmatpush.bf16.msrb.mxu1 %v1221_v31 }
 0x462   : > { %v722_v34 = vpack.c.bf16 %v721_v33, %v721_v33  ;;  %v760_v36 = vpop.f32.mrf.mxu1 }
 0x464   : > { %1177 = vmatmul.msk.bf16.vlgmr.msrb.gmra.mxu0 %vm609_vm6, %v722_v34 }
 0x465   : > { %986 = vmatpush.bf16.msrb.mxu0 %v1218_v27  ;;  %1037 = vmatpush.bf16.msrb.mxu1 %v1220_v46 }
 0x467   : > { %v718_v37 = vpop.f32.mrf.mxu2 }
 0x46a   : > { %v859_v38 = vpop.f32.mrf.mxu1 }
 0x46b   : > { %v860_v39 = vadd.f32 %v1707_v48, %v859_v38 }
 0x46d   : > { %v863_v40 = vsel %vm609_vm6, %v860_v39, -inf }
 0x46e   : > { %864 = vmax.xlane.f32.xlu1 %v863_v40 }
 0x472   : > { %v861_v41 = vpop.f32.mrf.mxu1 }
 0x487   : > { %795 = vrot.lane.b32.xlu1 %v1693_v35, %s1460_s19  ;;  %s1868_s19 = sld [smem:[#allocation19_spill]] }
 0x48d   : > { %s1062_s0 = scalar_lea.hbm %s1868_s19, %s1212_s18  ;;  %s1397_s21 = scalar_lea.hbm %s1868_s19, 64 }
 0x48e   : > { %s1066_s20 = sshll.u32 %s1062_s0, 4  ;;  %s1067_s20 = int_to_ptr.hbm [resolvable:$true] %s1066_s20 }
 0x48f   : > { %s1391_s13 = sshra.s32 %s1067_s20, 4  ;;  %s1392_s13 = int_to_ptr.hbm [resolvable:$true] %s1391_s13 }
 0x490   : > { %s1393_s15 = scalar_lea.hbm %s1392_s13, 8  ;;  %p1398_p9 = scmp.lt.s32.totalorder %s1392_s13, %s1868_s19 }
 0x491   : > { %p1394_p6 = scmp.ne.s32.totalorder %s1392_s13, %s1393_s15  ;;  %p1399_p1 = scmp.lt.s32.totalorder %s1397_s21, %s1393_s15 }
 0x493   : > { %p1395_p12 = pnand %p1394_p6, %p1585_p10  ;;  %p1400_p3 = por %p1399_p1, %p1398_p9 }
 0x495   : > { %p1396_p2 = pneg %p1395_p12 }
 0x497   : > { %p1401_p13 = pnand %p1400_p3, %p1396_p2 }
 0x4e1   : > { %v739_v43 = vpop.f32.mrf.mxu0  ;;  %v865_v44 = vpop.xlane.xlu1 %864 }
 0x4e2   : > { %v866_v45 = vsub.f32 %v860_v39, %v865_v44  ;;  %v759_v12 = vadd.f32 %v758_v30, %v739_v43 }
 0x4e4   : > { %v867_v47 = vmul.f32 1.442695, %v866_v45 }
 0x4e6   : > { %1307 = vpow2.f32 %v867_v47  ;;  %v1219_v47 = vld [vmem:[%s1841_s12] sm:$0xff] }
 0x4e7   : > { %1309 = vpow2.f32 %v789_v49  ;;  %1038 = vmatpush.bf16.msrb.mxu1 %v1219_v47  ;;  %v1293_v49 = vld [vmem:[%s1840_s11] ss:$0 sm:$0xff] }
 0x4e9   : > { %v741_v50 = vpop.f32.mrf.mxu0 }
 0x4ec   : > { %v1308_v51 = vpop.eup %1307 }
 0x4ed   : > { %v872_v52 = vpack.c.bf16 %v1308_v51, %v1308_v51  ;;  %v869_v48 = vsel %vm609_vm6, %v1308_v51, 0.0  ;;  %v1310_v53 = vpop.eup %1309 }
 0x4ee   : > { %870 = vadd.xlane.f32.xlu2 %v869_v48  ;;  %v791_v35 = vsel %vm609_vm6, %v1310_v53, 0.0  ;;  %v794_v56 = vpack.c.bf16 %v1310_v53, %v1310_v53 }
 0x4ef   : > { %1183 = vmatmul.msk.bf16.vlgmr.msra.gmra.mxu3 %vm609_vm6, %v872_v52 }
 0x4f6   : > { %792 = vadd.xlane.f32.xlu2 %v791_v35  ;;  %v1294_v35 = vld [vmem:[%s1869_s29] ss:$0 sm:$0xff] }
 0x4f9   : > { %v796_v54 = vpop.permute.xlu1 %795 }
 0x4fa   : > { %v801_v55 = vsel %vm644_vm5, %v796_v54, 0 }
 0x4fb   : > { %810 = vmatpush.bf16.msra.mxu2 %v801_v55 }
 0x4fe   : > { %1180 = vmatmul.msk.bf16.vlgmr.msra.gmra.mxu2 %vm609_vm6, %v794_v56 }
 0x4ff   : > { %911 = vmatpush.bf16.msrb.mxu2 %v902_v58 }
 0x561   : > { %v871_v61 = vpop.xlane.xlu2 %870 }
 0x562   : > { %1311 = vrcp.f32 %v871_v61 }
 0x568   : > { %v1312_v62 = vpop.eup %1311 }
 0x569   : > { %v793_v3 = vpop.xlane.xlu2 %792 }
 0x56a   : > { %1313 = vrcp.f32 %v793_v3 }
 0x570   : > { %v1314_v5 = vpop.eup %1313 }
 0x572   : > { %v890_v63 = vpop.f32.mrf.mxu3 }
 0x573   : > { %v895_v1 = vmul.f32 %v1312_v62, %v890_v63 }
 0x575   : > { %v896_v2 = vpack.c.bf16 %v895_v1, %v895_v1 }
 0x577   : > { %1184 = vmatmul.msk.bf16.vlgmr.msrb.gmra.mxu2 %vm609_vm6, %v896_v2 }
 0x57a   : > { %v892_v4 = vpop.f32.mrf.mxu3 }
 0x581   : > { %v812_v6 = vpop.f32.mrf.mxu2 }
 0x582   : > { %v817_v7 = vmul.f32 %v1314_v5, %v812_v6 }
 0x584   : > { %v818_v9 = vpack.c.bf16 %v817_v7, %v817_v7 }
 0x586   : > { %1181 = vmatmul.msk.bf16.vlgmr.msra.gmra.mxu0 %vm609_vm6, %v818_v9 }
 0x589   : > { %v814_v10 = vpop.f32.mrf.mxu2 }
 0x5fa   : > { %v913_v11 = vpop.f32.mrf.mxu2 }
 0x602   : > { %v915_v13 = vpop.f32.mrf.mxu2 }
 0x603   : > { %v835_v14 = vpop.f32.mrf.mxu0 }
 0x604   : > { %v839_v15 = vadd.f32 %v835_v14, %v759_v12 }
 0x606   : > { %v917_v16 = vadd.f32 %v913_v11, %v839_v15 }
 0x608   : > { %v918_v18 = vadd.f32 %v917_v16, %v1667_v0  ;;  %v1217_v0 = vld [vmem:[%s1839_s10] sm:$0xff] }
 0x609   : > { %987 = vmatpush.bf16.msrb.mxu0 %v1217_v0 }
 0x60a   : > { %v923_v19 = vadd.f32 %v1290_v17, %v918_v18 }
 0x60b   : > { %v837_v20 = vpop.f32.mrf.mxu0 }
 0x60c   : > { %v926_v21 = vsel %vm524_vm0, %v923_v19, 0.0 }
 0x60d   : > { %927 = vadd.xlane.f32.xlu2 %v926_v21 }
 0x680   : > { %v928_v22 = vpop.xlane.xlu2 %927 }
 0x681   : > { %v929_v23 = vmul.f32 %v928_v22, %v1671_v8 }
 0x683   : > { %v930_v24 = vsub.f32 %v923_v19, %v929_v23 }
 0x685   : > { %v931_v25 = vmul.f32 %v930_v24, %v930_v24 }
 0x687   : > { %v932_v26 = vsel %vm524_vm0, %v931_v25, 0.0 }
 0x688   : > { %933 = vadd.xlane.f32.xlu1 %v932_v26 }
 0x6fb   : > { %v934_v29 = vpop.xlane.xlu1 %933 }
 0x6fc   : > { %v935_v30 = vmul.f32 %v934_v29, %v1671_v8  ;;  %v1291_v8 = vld [vmem:[%s1837_s8] ss:$0 sm:$0xff] }
 0x6fe   : > { %v936_v32 = vadd.f32 1e-05, %v935_v30 }
 0x700   : > { %1315 = vrsqrt.f32 %v936_v32  ;;  %vm943_vm8 = vweird.f32 %v936_v32 }
 0x706   : > { %v1316_v33 = vpop.eup %1315 }
 0x707   : > { %v938_v34 = vmul.f32 %v1316_v33, %v936_v32  ;;  %vm944_vm7 = vweird.f32 %v1316_v33 }
 0x708   : > { %vm945_vm9 = vmor %vm943_vm8, %vm944_vm7 }
 0x709   : > { %v939_v36 = vmul.f32 %v1316_v33, %v938_v34 }
 0x70b   : > { %v940_v37 = vmul.f32 0.5, %v939_v36 }
 0x70d   : > { %v941_v38 = vsub.f32 1.5, %v940_v37 }
 0x70f   : > { %v942_v39 = vmul.f32 %v1316_v33, %v941_v38 }
 0x711   : > { %v946_v40 = vsel %vm945_vm9, %v1316_v33, %v942_v39 }
 0x712   : > { %v947_v41 = vmul.f32 %v946_v40, %v930_v24 }
 0x714   : > { %v951_v43 = vmul.f32 %v1291_v8, %v947_v41 }
 0x716   : > { %v955_v44 = vadd.f32 %v1292_v42, %v951_v43 }
 0x718   : > { %v956_v45 = vpack.c.bf16 %v955_v44, %v955_v44 }
 0x71a   : > { %1193 = vmatmul.msk.bf16.vlgmr.msrb.gmra.mxu0 %vm524_vm0, %v956_v45 }
 0x797   : > { %v989_v50 = vpop.f32.mrf.mxu0 }
 0x798   : > { %v990_v51 = vadd.f32 %v1293_v49, %v989_v50 }
 0x79a   : > { %v993_v52 = vmax.f32 %v990_v51, 0.0 }
 0x79c   : > { %v994_v48 = vpack.c.bf16 %v993_v52, %v993_v52 }
 0x79e   : > { %1210 = vmatmul.msk.bf16.vlgmr.msrb.gmra.mxu1 %vm1027_vm10, %v994_v48 }
 0x79f   : > { %v991_v53 = vpop.f32.mrf.mxu0 }
 0x81b   : > { %v1040_v54 = vpop.f32.mrf.mxu1 }
 0x81c   : > { %v1044_v55 = vadd.f32 %v1040_v54, %v923_v19 }
 0x81e   : > { %v1049_v56 = vadd.f32 %v1294_v35, %v1044_v55 }
 0x820   : > { %1050 = vst.msk [vmem:[%s519_s23] sm:$0xff] %vm524_vm0, %v1049_v56 }
 0x821   : > { %1404 = shalt.err (!%p1401_p13)
}
 0x822   : > { %1227 = dma.vmem_to_hbm [thread:$0]  (%p1585_p10), %s1065_s28, 128, %s1067_s20, %s1052_s17  }
 0x823   : > { %v1042_v57 = vpop.f32.mrf.mxu1 }
 0x824 PF: > { %s1871_s27 = sld [smem:[#allocation11_spill]]  ;;  %p1241_p0 = scmp.ge.s32.totalorder %s1447_s16, 2 }
 0x826   : > { %p1237_p4 = pnand %p1241_p0, %p1589_p11 }
 0x828   : > { %p1238_p5 = pneg %p1237_p4 }
 0x82a   : > { %s1078_s24 = sand.u32 1, %s1871_s27  }
 0x82b   : > { %s1079_s29 = scalar_lea.sflag [#allocation4], %s1078_s24 }
 0x82c   : > { %1430 = dma.done.wait (%p1238_p5), %s1079_s29, 128  }
 0x82d   : > { %1432 = vsyncadd (%p1238_p5), %s1079_s29, 4294967168  ;;  %s1873_s16 = sld [smem:[#allocation13_spill]]  ;;  %s1876_s29 = smov %s1439_s30 }
 0x82e   : > { %s1874_s23 = sld [smem:[#allocation12_spill]] }
 0x82f   : > { %s1875_s15 = sld [smem:[#allocation14_spill]] }
 0x833   : > { %p30_p7 = scmp.ge.s32.totalorder %s1873_s16, 10  }
 0x834   : > { %s1877_s30 = smov %s1874_s23 }
 0x835   :  { %32 = sbr.rel (!%p30_p7) target bundleno = 11 (0xb), region = 134 }
 0x83a   :  { %1085 = vsyncpa [#allocation3], 1 }
 0x83b   :  { %1087 = vsyncpa [#allocation3 + $0x1], 1 }
 0x83c   :  { %1088 = vsyncpa [#allocation6], 1 }
 0x83d   :  { %1090 = vsyncpa [#allocation6 + $0x1], 1 }
 0x83e   :  { %1091 = vsyncpa [#allocation4], 1 }
 0x83f   :  { %1093 = vsyncpa [#allocation4 + $0x1], 1 }

</bundles_post_ra>
